<compile_context>
chip_gen: v6e
topology: v6e:2x2x1
jax: 0.10.0
libtpu: 0.0.40
codegen_flags: <defaults>
</compile_context>

<pallas_src>
import numpy as np
import jax
import jax.numpy as jnp
from jax.experimental import pallas as pl
from jax.experimental.pallas import tpu as pltpu

NEG_SLOPE = 0.01  # PyTorch LeakyReLU default


def cae_kernel(x_ref, win_ref, bin_ref, a_ref, bc_ref, we_ref, be_ref,
               dw_ref, bd_ref, wf_ref, bf_ref, en_ref, xhat_ref):
    x = x_ref[...]                                                    # (3, TB)

    # ---- input: Linear(3 -> 8) + LeakyReLU (feature-major) -----------------
    h = jnp.dot(win_ref[...], x, preferred_element_type=jnp.float32) + bin_ref[...]
    h = jnp.maximum(h, NEG_SLOPE * h)                                 # (8, TB)

    # ---- conv1: Conv1d(1->8,k=3) + MaxPool1d(2) + LeakyReLU -----------------
    # One stacked dot: rows 0..23 = conv output at position 2j, rows 24..47 at
    # position 2j+1 (PyTorch view(-1,24) row order). Split at 24 is sublane-
    # tile aligned. Conv bias is added once AFTER the max (exact).
    y = jnp.dot(a_ref[...], h, preferred_element_type=jnp.float32)   # (48, TB)
    p = jnp.maximum(y[:24], y[24:]) + bc_ref[...]                     # (24, TB)
    p = jnp.maximum(p, NEG_SLOPE * p)

    # ---- e_out: Linear(24 -> 8) + ELU(alpha=1) ------------------------------
    e = jnp.dot(we_ref[...], p, preferred_element_type=jnp.float32) + be_ref[...]
    # clamp the exp argument so large positive e never hits exp overflow
    en = jnp.where(e > 0, e, jnp.exp(jnp.minimum(e, 0.0)) - 1.0)      # (8, TB)
    en_ref[...] = en

    # ---- decode: ConvTranspose1d + ReLU + fc4, all on the MXU ---------------
    # dec[t] = relu(w[k]*en[i] + bd) with t = 3i+k-1; row 23 is zero padding
    # (its relu(bd) is multiplied by Wf_row[0,23]=0, so it contributes 0).
    dec = jnp.maximum(
        jnp.dot(dw_ref[...], en, preferred_element_type=jnp.float32) + bd_ref[...],
        0.0)                                                          # (24, TB)
    xhat_ref[...] = (jnp.dot(wf_ref[...], dec,
                             preferred_element_type=jnp.float32) + bf_ref[...])


def _round_up(n, m):
    return ((n + m - 1) // m) * m


def _cdiv(a, b):
    return -(-a // b)


def _const_spec(shape):
    nd = len(shape)
    return pl.BlockSpec(tuple(shape), lambda i, _nd=nd: (0,) * _nd)


def _choose_tiling(B, tile_b):
    """Pad batch to a multiple of 128 and pick a tile that divides it with
    minimal slack; prefer >=2 tiles so megacore / v7x's 2nd TC is used."""
    B128 = _round_up(max(B, 1), 128)
    tile_b = max(_round_up(tile_b, 128), 128)
    n_tiles = max(_cdiv(B128, tile_b), 1)
    if n_tiles == 1 and B128 >= 256:
        n_tiles = 2
    TB = _round_up(_cdiv(B128, n_tiles), 128)
    B_pad = TB * n_tiles
    return TB, B_pad, n_tiles


def prepare_cae_params(params):
    """One-time host-side folding of PyTorch parameters into the feature-major
    matrices the kernel consumes (pure numpy glue, no traced .at[].set)."""
    W_in, b_in, Wc, bc, We, be, Wd, bd, Wf, bf = [
        np.asarray(p, np.float32) for p in params]

    # conv1: fold Conv1d(1->8,k=3) + MaxPool1d(2) into one stacked (48,8) map.
    Wc2 = Wc.reshape(8, 3)
    A = np.zeros((48, 8), np.float32)
    for oc in range(8):
        for j in range(3):
            r = oc * 3 + j                       # PyTorch view(-1, 24) order
            A[r, 2 * j:2 * j + 3] = Wc2[oc]          # conv output at pos 2j
            A[24 + r, 2 * j + 1:2 * j + 4] = Wc2[oc]  # conv output at pos 2j+1
    bc24 = np.repeat(bc, 3).reshape(24, 1)

    # decode: ConvTranspose1d(1,1,k=3,s=3,p=1,op=1) as a (24,8) scatter matrix
    # (23 real rows + 1 zero pad row so the sublane dim is a multiple of 8).
    w = Wd.reshape(3)
    Dw = np.zeros((24, 8), np.float32)
    for i in range(8):
        for k in range(3):
            t = 3 * i + k - 1
            if 0 <= t < 23:
                Dw[t, i] = w[k]
    Wf_row = np.zeros((1, 24), np.float32)
    Wf_row[0, :23] = Wf.reshape(23)              # padded column 23 -> weight 0
    bd_col = np.full((1, 1), float(bd.reshape(-1)[0]), np.float32)

    prepped = (W_in.reshape(8, 3), b_in.reshape(8, 1), A, bc24,
               We.reshape(8, 24), be.reshape(8, 1),
               Dw, bd_col, Wf_row, bf.reshape(1, 1))
    return tuple(jnp.asarray(a) for a in prepped)


def cae_forward(x, prepped_params, *, tile_b=32768,
                vmem_limit_bytes=48 * 1024 * 1024, feature_major_io=False):
    """PyTorch semantics.

    Batch-major (default): x (B, 3) -> (en_out (B, 8), x_hat (B, 1)).
    feature_major_io=True: x (3, B) -> (en_out (8, B), x_hat (1, B)), skipping
    the wrapper-side transpose passes entirely (use when the surrounding model
    can stay feature-major).
    """
    if feature_major_io:
        B = x.shape[1]
        xT = x.astype(jnp.float32)
    else:
        B = x.shape[0]
        xT = jnp.transpose(x.astype(jnp.float32))
    TB, B_pad, n_tiles = _choose_tiling(B, tile_b)
    if B_pad != B:
        xT = jnp.pad(xT, ((0, 0), (0, B_pad - B)))

    weight_specs = [_const_spec(p.shape) for p in prepped_params]
    weight_bytes = int(sum(int(p.size) * 4 for p in prepped_params))
    cost = pl.CostEstimate(
        flops=1700 * B_pad,              # 5 small dots + elementwise
        transcendentals=8 * B_pad,       # ELU exp
        bytes_accessed=48 * B_pad + weight_bytes)

    en_t, xhat_t = pl.pallas_call(
        cae_kernel,
        grid=(n_tiles,),
        in_specs=[pl.BlockSpec((3, TB), lambda i: (0, i))] + weight_specs,
        out_specs=(pl.BlockSpec((8, TB), lambda i: (0, i)),
                   pl.BlockSpec((1, TB), lambda i: (0, i))),
        out_shape=(jax.ShapeDtypeStruct((8, B_pad), jnp.float32),
                   jax.ShapeDtypeStruct((1, B_pad), jnp.float32)),
        compiler_params=pltpu.CompilerParams(
            dimension_semantics=("parallel",),
            vmem_limit_bytes=vmem_limit_bytes),
        cost_estimate=cost,
    )(xT, *prepped_params)

    if feature_major_io:
        return en_t[:, :B], xhat_t[:, :B]
    # strip batch padding, back to PyTorch's batch-major layout (wrapper glue)
    return en_t[:, :B].T, xhat_t[:, :B].T


def _reference(x, params):
    """Pure numpy reference with exact PyTorch semantics."""
    W_in, b_in, Wc, bc, We, be, Wd, bd, Wf, bf = [np.asarray(p) for p in params]
    x = np.asarray(x)
    B = x.shape[0]
    h = x @ W_in.T + b_in
    h = np.where(h > 0, h, NEG_SLOPE * h)                            # (B, 8)
    y = np.zeros((B, 8, 6), np.float32)
    for oc in range(8):
        for t in range(6):
            y[:, oc, t] = (h[:, t:t + 3] * Wc[oc, 0]).sum(-1) + bc[oc]
    p = np.maximum(y[:, :, 0::2], y[:, :, 1::2])                     # (B, 8, 3)
    p = np.where(p > 0, p, NEG_SLOPE * p)
    flat = p.reshape(B, 24)
    e = flat @ We.T + be
    en = np.where(e > 0, e, np.exp(e) - 1.0)
    dec = np.zeros((B, 23), np.float32) + bd[0]
    w = Wd[0, 0]
    for i in range(8):
        for k in range(3):
            t = 3 * i + k - 1
            if 0 <= t < 23:
                dec[:, t] += en[:, i] * w[k]
    dec = np.maximum(dec, 0.0)
    xhat = dec @ Wf.T + bf
    return en, xhat


if __name__ == "__main__":
    key = jax.random.PRNGKey(0)
    ks = jax.random.split(key, 12)

    def rnd(k, shape, scale=0.3):
        return scale * jax.random.normal(k, shape, dtype=jnp.float32)

    W_in = rnd(ks[0], (8, 3));    b_in = rnd(ks[1], (8,))
    Wc   = rnd(ks[2], (8, 1, 3)); bc   = rnd(ks[3], (8,))
    We   = rnd(ks[4], (8, 24));   be   = rnd(ks[5], (8,))
    Wd   = rnd(ks[6], (1, 1, 3)); bd   = rnd(ks[7], (1,))
    Wf   = rnd(ks[8], (1, 23));   bf   = rnd(ks[9], (1,))
    params = (W_in, b_in, Wc, bc, We, be, Wd, bd, Wf, bf)
    prepped = prepare_cae_params(params)

    # small batch (single 128-lane tile, padded)
    x_small = jax.random.normal(ks[10], (8, 3), dtype=jnp.float32)
    en, xhat = cae_forward(x_small, prepped)
    jax.block_until_ready((en, xhat))
    en_ref, xhat_ref = _reference(x_small, params)
    np.testing.assert_allclose(np.asarray(en), en_ref, rtol=1e-5, atol=1e-5)
    np.testing.assert_allclose(np.asarray(xhat), xhat_ref, rtol=1e-5, atol=1e-5)
    assert en.shape == (8, 8) and xhat.shape == (8, 1)

    # multi-tile batch with a ragged tail (exercises grid > 1 + tail padding)
    x_big = jax.random.normal(ks[11], (200, 3), dtype=jnp.float32)
    en2, xhat2 = cae_forward(x_big, prepped, tile_b=128)
    jax.block_until_ready((en2, xhat2))
    en2_ref, xhat2_ref = _reference(x_big, params)
    np.testing.assert_allclose(np.asarray(en2), en2_ref, rtol=1e-5, atol=1e-5)
    np.testing.assert_allclose(np.asarray(xhat2), xhat2_ref, rtol=1e-5, atol=1e-5)

    # feature-major I/O path (no wrapper transposes) must match batch-major
    en3, xhat3 = cae_forward(jnp.transpose(x_big), prepped, tile_b=128,
                             feature_major_io=True)
    jax.block_until_ready((en3, xhat3))
    np.testing.assert_allclose(np.asarray(en3).T, en2_ref, rtol=1e-5, atol=1e-5)
    np.testing.assert_allclose(np.asarray(xhat3).T, xhat2_ref, rtol=1e-5, atol=1e-5)

    print("KERNEL_OK")
</pallas_src>

<mosaic_0001>
module attributes {stable_mosaic.version = 11 : i64} {
  func.func @cae_kernel(%arg0: i32, %arg1: memref<3x128xf32, #tpu.memory_space<vmem>>, %arg2: memref<8x3xf32, #tpu.memory_space<vmem>>, %arg3: memref<8x1xf32, #tpu.memory_space<vmem>>, %arg4: memref<48x8xf32, #tpu.memory_space<vmem>>, %arg5: memref<24x1xf32, #tpu.memory_space<vmem>>, %arg6: memref<8x24xf32, #tpu.memory_space<vmem>>, %arg7: memref<8x1xf32, #tpu.memory_space<vmem>>, %arg8: memref<24x8xf32, #tpu.memory_space<vmem>>, %arg9: memref<1x1xf32, #tpu.memory_space<vmem>>, %arg10: memref<1x24xf32, #tpu.memory_space<vmem>>, %arg11: memref<1x1xf32, #tpu.memory_space<vmem>>, %arg12: memref<8x128xf32, #tpu.memory_space<vmem>>, %arg13: memref<1x128xf32, #tpu.memory_space<vmem>>) attributes {dimension_semantics = [#tpu.dimension_semantics<parallel>], iteration_bounds = array<i64: 1>, scalar_prefetch = 0 : i64, scratch_operands = 0 : i64, tpu.core_type = #tpu.core_type<tc>, window_params = [{transform_indices = @transform_0, window_bounds = array<i64: 3, 128>}, {pipeline_mode = #tpu.pipeline_mode<synchronous>, transform_indices = @transform_1, window_bounds = array<i64: 8, 3>}, {pipeline_mode = #tpu.pipeline_mode<synchronous>, transform_indices = @transform_2, window_bounds = array<i64: 8, 1>}, {pipeline_mode = #tpu.pipeline_mode<synchronous>, transform_indices = @transform_3, window_bounds = array<i64: 48, 8>}, {pipeline_mode = #tpu.pipeline_mode<synchronous>, transform_indices = @transform_4, window_bounds = array<i64: 24, 1>}, {pipeline_mode = #tpu.pipeline_mode<synchronous>, transform_indices = @transform_5, window_bounds = array<i64: 8, 24>}, {pipeline_mode = #tpu.pipeline_mode<synchronous>, transform_indices = @transform_6, window_bounds = array<i64: 8, 1>}, {pipeline_mode = #tpu.pipeline_mode<synchronous>, transform_indices = @transform_7, window_bounds = array<i64: 24, 8>}, {pipeline_mode = #tpu.pipeline_mode<synchronous>, transform_indices = @transform_8, window_bounds = array<i64: 1, 1>}, {pipeline_mode = #tpu.pipeline_mode<synchronous>, transform_indices = @transform_9, window_bounds = array<i64: 1, 24>}, {pipeline_mode = #tpu.pipeline_mode<synchronous>, transform_indices = @transform_10, window_bounds = array<i64: 1, 1>}, {transform_indices = @transform_11, window_bounds = array<i64: 8, 128>}, {transform_indices = @transform_12, window_bounds = array<i64: 1, 128>}]} {
    %c0 = arith.constant 0 : index
    %c0_0 = arith.constant 0 : index
    %0 = vector.load %arg1[%c0, %c0_0] : memref<3x128xf32, #tpu.memory_space<vmem>>, vector<3x128xf32>
    %c0_1 = arith.constant 0 : index
    %c0_2 = arith.constant 0 : index
    %1 = vector.load %arg2[%c0_1, %c0_2] : memref<8x3xf32, #tpu.memory_space<vmem>>, vector<8x3xf32>
    %cst = arith.constant dense<0.000000e+00> : vector<8x128xf32>
    %2 = tpu.matmul %1, %0, %cst {dimension_numbers = #tpu.dot_dimension_numbers<[1], [0], [0], [1], [0, 0, 1, 1], [], []>} : vector<8x3xf32>, vector<3x128xf32>, vector<8x128xf32> -> vector<8x128xf32>
    %c0_3 = arith.constant 0 : index
    %c0_4 = arith.constant 0 : index
    %3 = vector.load %arg3[%c0_3, %c0_4] : memref<8x1xf32, #tpu.memory_space<vmem>>, vector<8x1xf32>
    %4 = vector.broadcast %3 : vector<8x1xf32> to vector<8x128xf32>
    %5 = arith.addf %2, %4 : vector<8x128xf32>
    %cst_5 = arith.constant 0.00999999977 : f32
    %6 = vector.broadcast %cst_5 : f32 to vector<8x128xf32>
    %7 = arith.mulf %6, %5 : vector<8x128xf32>
    %8 = arith.maximumf %5, %7 : vector<8x128xf32>
    %c0_6 = arith.constant 0 : index
    %c0_7 = arith.constant 0 : index
    %9 = vector.load %arg4[%c0_6, %c0_7] : memref<48x8xf32, #tpu.memory_space<vmem>>, vector<48x8xf32>
    %cst_8 = arith.constant dense<0.000000e+00> : vector<48x128xf32>
    %10 = tpu.matmul %9, %8, %cst_8 {dimension_numbers = #tpu.dot_dimension_numbers<[1], [0], [0], [1], [0, 0, 1, 1], [], []>} : vector<48x8xf32>, vector<8x128xf32>, vector<48x128xf32> -> vector<48x128xf32>
    %11 = vector.extract_strided_slice %10 {offsets = [0, 0], sizes = [24, 128], strides = [1, 1]} : vector<48x128xf32> to vector<24x128xf32>
    %12 = vector.extract_strided_slice %10 {offsets = [24, 0], sizes = [24, 128], strides = [1, 1]} : vector<48x128xf32> to vector<24x128xf32>
    %13 = arith.maximumf %11, %12 : vector<24x128xf32>
    %c0_9 = arith.constant 0 : index
    %c0_10 = arith.constant 0 : index
    %14 = vector.load %arg5[%c0_9, %c0_10] : memref<24x1xf32, #tpu.memory_space<vmem>>, vector<24x1xf32>
    %15 = vector.broadcast %14 : vector<24x1xf32> to vector<24x128xf32>
    %16 = arith.addf %13, %15 : vector<24x128xf32>
    %cst_11 = arith.constant 0.00999999977 : f32
    %17 = vector.broadcast %cst_11 : f32 to vector<24x128xf32>
    %18 = arith.mulf %17, %16 : vector<24x128xf32>
    %19 = arith.maximumf %16, %18 : vector<24x128xf32>
    %c0_12 = arith.constant 0 : index
    %c0_13 = arith.constant 0 : index
    %20 = vector.load %arg6[%c0_12, %c0_13] : memref<8x24xf32, #tpu.memory_space<vmem>>, vector<8x24xf32>
    %cst_14 = arith.constant dense<0.000000e+00> : vector<8x128xf32>
    %21 = tpu.matmul %20, %19, %cst_14 {dimension_numbers = #tpu.dot_dimension_numbers<[1], [0], [0], [1], [0, 0, 1, 1], [], []>} : vector<8x24xf32>, vector<24x128xf32>, vector<8x128xf32> -> vector<8x128xf32>
    %c0_15 = arith.constant 0 : index
    %c0_16 = arith.constant 0 : index
    %22 = vector.load %arg7[%c0_15, %c0_16] : memref<8x1xf32, #tpu.memory_space<vmem>>, vector<8x1xf32>
    %23 = vector.broadcast %22 : vector<8x1xf32> to vector<8x128xf32>
    %24 = arith.addf %21, %23 : vector<8x128xf32>
    %cst_17 = arith.constant 0.000000e+00 : f32
    %25 = vector.broadcast %cst_17 : f32 to vector<8x128xf32>
    %26 = arith.cmpf ogt, %24, %25 : vector<8x128xf32>
    %cst_18 = arith.constant 0.000000e+00 : f32
    %27 = vector.broadcast %cst_18 : f32 to vector<8x128xf32>
    %28 = arith.minimumf %24, %27 : vector<8x128xf32>
    %29 = math.exp %28 : vector<8x128xf32>
    %cst_19 = arith.constant 1.000000e+00 : f32
    %30 = vector.broadcast %cst_19 : f32 to vector<8x128xf32>
    %31 = arith.subf %29, %30 : vector<8x128xf32>
    %32 = arith.select %26, %24, %31 : vector<8x128xi1>, vector<8x128xf32>
    %c0_20 = arith.constant 0 : index
    %c0_21 = arith.constant 0 : index
    %33 = vector.load %arg12[%c0_20, %c0_21] : memref<8x128xf32, #tpu.memory_space<vmem>>, vector<8x128xf32>
    tpu.vector_store %arg12[%c0_20, %c0_21], %32 {strides = array<i32>} : memref<8x128xf32, #tpu.memory_space<vmem>>, vector<8x128xf32>,
    %c0_22 = arith.constant 0 : index
    %c0_23 = arith.constant 0 : index
    %34 = vector.load %arg8[%c0_22, %c0_23] : memref<24x8xf32, #tpu.memory_space<vmem>>, vector<24x8xf32>
    %cst_24 = arith.constant dense<0.000000e+00> : vector<24x128xf32>
    %35 = tpu.matmul %34, %32, %cst_24 {dimension_numbers = #tpu.dot_dimension_numbers<[1], [0], [0], [1], [0, 0, 1, 1], [], []>} : vector<24x8xf32>, vector<8x128xf32>, vector<24x128xf32> -> vector<24x128xf32>
    %c0_25 = arith.constant 0 : index
    %c0_26 = arith.constant 0 : index
    %36 = vector.load %arg9[%c0_25, %c0_26] : memref<1x1xf32, #tpu.memory_space<vmem>>, vector<1x1xf32>
    %37 = vector.broadcast %36 : vector<1x1xf32> to vector<24x128xf32>
    %38 = arith.addf %35, %37 : vector<24x128xf32>
    %cst_27 = arith.constant 0.000000e+00 : f32
    %39 = vector.broadcast %cst_27 : f32 to vector<24x128xf32>
    %40 = arith.maximumf %38, %39 : vector<24x128xf32>
    %c0_28 = arith.constant 0 : index
    %c0_29 = arith.constant 0 : index
    %41 = vector.load %arg10[%c0_28, %c0_29] : memref<1x24xf32, #tpu.memory_space<vmem>>, vector<1x24xf32>
    %cst_30 = arith.constant dense<0.000000e+00> : vector<1x128xf32>
    %42 = tpu.matmul %41, %40, %cst_30 {dimension_numbers = #tpu.dot_dimension_numbers<[1], [0], [0], [1], [0, 0, 1, 1], [], []>} : vector<1x24xf32>, vector<24x128xf32>, vector<1x128xf32> -> vector<1x128xf32>
    %c0_31 = arith.constant 0 : index
    %c0_32 = arith.constant 0 : index
    %43 = vector.load %arg11[%c0_31, %c0_32] : memref<1x1xf32, #tpu.memory_space<vmem>>, vector<1x1xf32>
    %44 = vector.broadcast %43 : vector<1x1xf32> to vector<1x128xf32>
    %45 = arith.addf %42, %44 : vector<1x128xf32>
    %c0_33 = arith.constant 0 : index
    %c0_34 = arith.constant 0 : index
    %46 = vector.load %arg13[%c0_33, %c0_34] : memref<1x128xf32, #tpu.memory_space<vmem>>, vector<1x128xf32>
    tpu.vector_store %arg13[%c0_33, %c0_34], %45 {strides = array<i32>} : memref<1x128xf32, #tpu.memory_space<vmem>>, vector<1x128xf32>,
    return
  }
  func.func @transform_0(%arg0: i32) -> (i32, i32) {
    %c0_i32 = arith.constant 0 : i32
    %c0_i32_0 = arith.constant 0 : i32
    return %c0_i32, %arg0 : i32, i32
  }
  func.func @transform_1(%arg0: i32) -> (i32, i32) {
    %c0_i32 = arith.constant 0 : i32
    %c0_i32_0 = arith.constant 0 : i32
    %c0_i32_1 = arith.constant 0 : i32
    return %c0_i32, %c0_i32_0 : i32, i32
  }
  func.func @transform_2(%arg0: i32) -> (i32, i32) {
    %c0_i32 = arith.constant 0 : i32
    %c0_i32_0 = arith.constant 0 : i32
    %c0_i32_1 = arith.constant 0 : i32
    return %c0_i32, %c0_i32_0 : i32, i32
  }
  func.func @transform_3(%arg0: i32) -> (i32, i32) {
    %c0_i32 = arith.constant 0 : i32
    %c0_i32_0 = arith.constant 0 : i32
    %c0_i32_1 = arith.constant 0 : i32
    return %c0_i32, %c0_i32_0 : i32, i32
  }
  func.func @transform_4(%arg0: i32) -> (i32, i32) {
    %c0_i32 = arith.constant 0 : i32
    %c0_i32_0 = arith.constant 0 : i32
    %c0_i32_1 = arith.constant 0 : i32
    return %c0_i32, %c0_i32_0 : i32, i32
  }
  func.func @transform_5(%arg0: i32) -> (i32, i32) {
    %c0_i32 = arith.constant 0 : i32
    %c0_i32_0 = arith.constant 0 : i32
    %c0_i32_1 = arith.constant 0 : i32
    return %c0_i32, %c0_i32_0 : i32, i32
  }
  func.func @transform_6(%arg0: i32) -> (i32, i32) {
    %c0_i32 = arith.constant 0 : i32
    %c0_i32_0 = arith.constant 0 : i32
    %c0_i32_1 = arith.constant 0 : i32
    return %c0_i32, %c0_i32_0 : i32, i32
  }
  func.func @transform_7(%arg0: i32) -> (i32, i32) {
    %c0_i32 = arith.constant 0 : i32
    %c0_i32_0 = arith.constant 0 : i32
    %c0_i32_1 = arith.constant 0 : i32
    return %c0_i32, %c0_i32_0 : i32, i32
  }
  func.func @transform_8(%arg0: i32) -> (i32, i32) {
    %c0_i32 = arith.constant 0 : i32
    %c0_i32_0 = arith.constant 0 : i32
    %c0_i32_1 = arith.constant 0 : i32
    return %c0_i32, %c0_i32_0 : i32, i32
  }
  func.func @transform_9(%arg0: i32) -> (i32, i32) {
    %c0_i32 = arith.constant 0 : i32
    %c0_i32_0 = arith.constant 0 : i32
    %c0_i32_1 = arith.constant 0 : i32
    return %c0_i32, %c0_i32_0 : i32, i32
  }
  func.func @transform_10(%arg0: i32) -> (i32, i32) {
    %c0_i32 = arith.constant 0 : i32
    %c0_i32_0 = arith.constant 0 : i32
    %c0_i32_1 = arith.constant 0 : i32
    return %c0_i32, %c0_i32_0 : i32, i32
  }
  func.func @transform_11(%arg0: i32) -> (i32, i32) {
    %c0_i32 = arith.constant 0 : i32
    %c0_i32_0 = arith.constant 0 : i32
    return %c0_i32, %arg0 : i32, i32
  }
  func.func @transform_12(%arg0: i32) -> (i32, i32) {
    %c0_i32 = arith.constant 0 : i32
    %c0_i32_0 = arith.constant 0 : i32
    return %c0_i32, %arg0 : i32, i32
  }
}

</mosaic_0001>

<bundles_post_ra>
// kernel: tpu_custom_call.1
= control target key start
LH: loop header
LB: loop body
LE: loop exit
PB: predicated region body
PF: predicated region fallthrough
CT: control target
= control target key end

     0   :  { %s891_s0 = inlined_call_operand.vmem [shape: f32[3,128], index: 0, kind: input, shape index: {}]   ;;  %s892_s1 = inlined_call_operand.vmem [shape: f32[8,3], index: 1, kind: input, shape index: {}]   ;;  %s893_s2 = inlined_call_operand.vmem [shape: f32[8,1], index: 2, kind: input, shape index: {}]   ;;  %s894_s3 = inlined_call_operand.vmem [shape: f32[48,8], index: 3, kind: input, shape index: {}]   ;;  %s895_s4 = inlined_call_operand.vmem [shape: f32[24,1], index: 4, kind: input, shape index: {}]   ;;  %s896_s5 = inlined_call_operand.vmem [shape: f32[8,24], index: 5, kind: input, shape index: {}]   ;;  %s897_s6 = inlined_call_operand.vmem [shape: f32[8,1], index: 6, kind: input, shape index: {}]   ;;  %s898_s7 = inlined_call_operand.vmem [shape: f32[24,8], index: 7, kind: input, shape index: {}]   ;;  %s899_s8 = inlined_call_operand.<no memory space> [shape: f32[1,1], index: 8, kind: input, shape index: {}]   ;;  %s900_s9 = inlined_call_operand.vmem [shape: f32[1,24], index: 9, kind: input, shape index: {}]   ;;  %s901_s11 = inlined_call_operand.hbm [shape: f32[8,128], index: 11, kind: output, shape index: {0}]   ;;  %s902_s12 = inlined_call_operand.hbm [shape: f32[1,128], index: 12, kind: output, shape index: {1}]   ;;  %s903_s10 = inlined_call_operand.<no memory space> [shape: f32[1,1], index: 10, kind: input, shape index: {}]  }
   0x1   :  { %v18_v0 = vstv %s899_s8  ;;  %v20_v1 = vstv %s903_s10 }
   0x2   :  { %19 = vst [vmem:[#allocation2] sm:$0x1] %v18_v0  ;;  %21 = vst [vmem:[#allocation3] sm:$0x1] %v20_v1 }
   0x3   :  { %22 = vsyncpa [#allocation5], 0  ;;  %v46_v2 = vld [vmem:[%s891_s0] sm:$0x7]  ;;  %vm58_vm0 = vcmask 1042432   ;;  %v724_v4 = vmov 0.0  }
   0x4   :  { %v47_v3 = vld [vmem:[%s892_s1] sm:$0xff]  ;;  %626 = vmatprep.subr.mxu1 %v724_v4  ;;  %vm725_vm1 = vmmov 0   ;;  %vm54_vm2 = vcmask 23552   ;;  %v726_v6 = vmov 0  }
   0x5   :  { %628 = vmatprep.mubr.msk.f32.mxu1 %vm725_vm1, %v724_v4  ;;  %v48_v5 = vld [vmem:[%s893_s2] sm:$0xff]  ;;  %627 = vmatpush3.msk.msra.mxu1 %vm58_vm0, %v46_v2 }
   0x6   :  { %676 = vset.pattern.permute.xlu0 %v726_v6 }
   0x7   :  { %23 = vsyncpa [#allocation7], 0  ;;  %629 = vmatmul.mubr.msk.f32.vlgmr.msra.gmra.mxu1 %vm54_vm2, %v47_v3  ;;  %51 = vperm.xlu0 %676, %v48_v5   ;;  %v259_v7 = vld [vmem:[%s895_s4 + $0x10] sm:$0xff]  ;;  %v285_v8 = vld [vmem:[%s897_s6] sm:$0xff]  ;;  %vm140_vm3 = vcmask 64512   ;;  %vm291_vm4 = vcmask 195584  }
   0x8   :  { %677 = vset.pattern.permute.xlu1 %v726_v6  ;;  %642 = vmatprep.subr.mxu0 %v724_v4  ;;  %v134_v10 = vld [vmem:[%s894_s3] sm:$0xff]  ;;  %v258_v11 = vld [vmem:[%s895_s4 + $0x8] sm:$0xff]  ;;  %v136_v21 = vld [vmem:[%s894_s3 + $0x10] sm:$0xff]  ;;  %s727_s29 = smov [#allocation4]  }
   0x9   :  { %648 = vmatprep.mubr.msk.f32.mxu0 %vm725_vm1, %v724_v4  ;;  %v478_v9 = vld [vmem:[#allocation3] sm:$0x1]  ;;  %633 = vmatprep.mubr.msk.f32.mxu1 %vm140_vm3, %v134_v10  ;;  %v600_v13 = vld [vmem:[#allocation2] ss:$0 sm:$0xff]  ;;  %v135_v20 = vld [vmem:[%s894_s3 + $0x8] sm:$0xff]  ;;  %s568_s30 = sshll.u32 %s727_s29, 4  ;;  %s569_s30 = int_to_ptr.vmem [resolvable:$true] %s568_s30 }
   0xa   :  { %267 = vperm.xlu1 %677, %v258_v11   ;;  %v257_v12 = vld [vmem:[%s895_s4] sm:$0xff]  ;;  %v137_v22 = vld [vmem:[%s894_s3 + $0x18] sm:$0xff]  ;;  %v139_v24 = vld [vmem:[%s894_s3 + $0x28] sm:$0xff]  ;;  %s680_s2 = scalar_lea.vmem %s569_s30, 128  ;;  %p685_p1 = scmp.lt.s32.totalorder %s569_s30, %s569_s30 }
   0xb   :  { %272 = vperm.xlu0 %676, %v259_v7   ;;  %v138_v23 = vld [vmem:[%s894_s3 + $0x20] sm:$0xff]  ;;  %v373_v57 = vld [vmem:[%s898_s7 + $0x8] sm:$0xff]  ;;  %v374_v58 = vld [vmem:[%s898_s7 + $0x10] sm:$0xff]  ;;  %p681_p0 = scmp.ne.s32.totalorder %s569_s30, %s680_s2  ;;  %p686_p2 = scmp.lt.s32.totalorder %s680_s2, %s680_s2 }
   0xc   :  { %v284_v46 = vld [vmem:[%s896_s5] sm:$0xff] }
   0xd   :  { %v372_v55 = vld [vmem:[%s898_s7] sm:$0xff]  ;;  %p687_p3 = por %p686_p2, %p685_p1 }
   0xe   :  { %262 = vperm.xlu1 %677, %v257_v12  }
   0xf   :  { %288 = vperm.xlu0 %676, %v285_v8   ;;  %p688_p4 = pnand %p687_p3, %p681_p0 }
  0x12   :  { %382 = vperm.xlu1 %677, %v600_v13  }
  0x13   :  { %481 = vperm.xlu0 %676, %v478_v9   ;;  %v477_v9 = vld [vmem:[%s900_s9] sm:$0x1] }
  0x82   :  { %v52_v14 = vpop.permute.xlu0 %51 }
  0x85   :  { %v268_v26 = vpop.permute.xlu1 %267 }
  0x86   :  { %v273_v34 = vpop.permute.xlu0 %272 }
  0x89   :  { %v263_v31 = vpop.permute.xlu1 %262 }
  0x8a   :  { %v289_v47 = vpop.permute.xlu0 %288 }
  0x8d   :  { %v383_v63 = vpop.permute.xlu1 %382 }
  0xc7   :  { %v128_v15 = vpop.f32.mrf.mxu1 }
  0xc8   :  { %v129_v16 = vadd.f32 %v128_v15, %v52_v14 }
  0xc9   :  { %v630_v17 = vpop.f32.mrf.mxu1 }
  0xca   :  { %v132_v18 = vmul.f32 0.01, %v129_v16 }
  0xcc   :  { %v133_v19 = vmax.f32 %v129_v16, %v132_v18 }
  0xce   :  { %631 = vmatprep.subr.mxu1 %v133_v19 }
  0xcf   :  { %632 = vmatpush3.msra.mxu1 %v133_v19 }
  0xd0   :  { %634 = vmatmul.mubr.msk.f32.vlgmr.msra.gmra.mxu1 %vm140_vm3, %v135_v20  ;;  %662 = vmatprep.subr.mxu1 %v724_v4 }
  0xd1   :  { %636 = vmatprep.mubr.msk.f32.mxu1 %vm140_vm3, %v136_v21 }
  0xd4   :  { %637 = vmatmul.mubr.msk.f32.gmra.mxu1 %vm140_vm3, %v137_v22 }
  0xd5   :  { %639 = vmatprep.mubr.msk.f32.mxu1 %vm140_vm3, %v138_v23 }
  0xd8   :  { %640 = vmatmul.mubr.msk.f32.gmra.mxu1 %vm140_vm3, %v139_v24 }
  0xd9   :  { %668 = vmatprep.mubr.msk.f32.mxu1 %vm725_vm1, %v724_v4 }
 0x190   :  { %v635_v25 = vpop.f32.mrf.mxu1 }
 0x192   :  { %v225_v27 = vpop.f32.mrf.mxu1 }
 0x194   :  { %v638_v28 = vpop.f32.mrf.mxu1 }
 0x195   :  { %v254_v30 = vmax.f32 %v225_v27, %v638_v28 }
 0x196   :  { %v235_v29 = vpop.f32.mrf.mxu1 }
 0x197   :  { %v275_v36 = vadd.f32 %v263_v31, %v254_v30 }
 0x198   :  { %v641_v32 = vpop.f32.mrf.mxu1 }
 0x199   :  { %v256_v33 = vmax.f32 %v235_v29, %v641_v32  ;;  %v278_v41 = vmul.f32 0.01, %v275_v36 }
 0x19a   :  { %v245_v35 = vpop.f32.mrf.mxu1 }
 0x19b   :  { %v277_v37 = vadd.f32 %v273_v34, %v256_v33  ;;  %v255_v38 = vmax.f32 %v635_v25, %v245_v35  ;;  %v281_v45 = vmax.f32 %v275_v36, %v278_v41 }
 0x19d   :  { %v276_v39 = vadd.f32 %v268_v26, %v255_v38  ;;  %v280_v40 = vmul.f32 0.01, %v277_v37 }
 0x19f   :  { %v279_v42 = vmul.f32 0.01, %v276_v39  ;;  %v283_v43 = vmax.f32 %v277_v37, %v280_v40 }
 0x1a1   :  { %643 = vmatpush3.msra.mxu0 %v283_v43  ;;  %v282_v44 = vmax.f32 %v276_v39, %v279_v42 }
 0x1a2   :  { %644 = vmatprep.subr.mxu0 %v724_v4 }
 0x1a3   :  { %645 = vmatpush3.msra.mxu0 %v282_v44 }
 0x1a4   :  { %646 = vmatprep.subr.mxu0 %v724_v4 }
 0x1a5   :  { %647 = vmatpush3.msra.mxu0 %v281_v45 }
 0x1a6   :  { %649 = vmatmul.mubr.msk.f32.vlgmr.msra.gmra.mxu0 %vm291_vm4, %v284_v46  ;;  %651 = vmatprep.subr.mxu0 %v724_v4 }
 0x1a7   :  { %653 = vmatprep.mubr.msk.f32.mxu0 %vm725_vm1, %v724_v4 }
 0x266   :  { %v361_v48 = vpop.f32.mrf.mxu0 }
 0x267   :  { %v362_v49 = vadd.f32 %v361_v48, %v289_v47 }
 0x268   :  { %v650_v50 = vpop.f32.mrf.mxu0 }
 0x269   :  { %v366_v51 = vmin.f32 %v362_v49, 0.0  ;;  %vm365_vm5 = vcmp.gt.f32.partialorder %v362_v49, 0.0 }
 0x26b   :  { %v367_v52 = vmul.f32 1.442695, %v366_v51 }
 0x26d   :  { %678 = vpow2.f32 %v367_v52 }
 0x27a   :  { %v679_v53 = vpop.eup %678 }
 0x27b   :  { %v599_v54 = vadd.f32 -1.0, %v679_v53 }
 0x27d   :  { %v370_v56 = vsel %vm365_vm5, %v362_v49, %v599_v54 }
 0x27e   :  { %652 = vmatpush3.msra.mxu0 %v370_v56  ;;  %371 = vst [vmem:[#allocation4] sm:$0xff] %v370_v56 }
 0x27f   :  { %654 = vmatmul.mubr.msk.f32.vlgmr.msra.gmra.mxu0 %vm140_vm3, %v372_v55 }
 0x280   :  { %656 = vmatprep.mubr.msk.f32.mxu0 %vm725_vm1, %v724_v4 }
 0x283   :  { %657 = vmatmul.mubr.msk.f32.gmra.mxu0 %vm140_vm3, %v373_v57 }
 0x284   :  { %659 = vmatprep.mubr.msk.f32.mxu0 %vm725_vm1, %v724_v4 }
 0x287   :  { %660 = vmatmul.mubr.msk.f32.gmra.mxu0 %vm140_vm3, %v374_v58 }
 0x33f   :  { %v460_v59 = vpop.f32.mrf.mxu0 }
 0x340   :  { %v461_v5 = vadd.f32 %v460_v59, %v383_v63 }
 0x341   :  { %v655_v60 = vpop.f32.mrf.mxu0 }
 0x342   :  { %v474_v8 = vmax.f32 %v461_v5, 0.0 }
 0x343   :  { %v465_v61 = vpop.f32.mrf.mxu0 }
 0x344   :  { %v466_v1 = vadd.f32 %v465_v61, %v383_v63 }
 0x345   :  { %v658_v62 = vpop.f32.mrf.mxu0 }
 0x346   :  { %v475_v7 = vmax.f32 %v466_v1, 0.0 }
 0x347   :  { %v470_v0 = vpop.f32.mrf.mxu0 }
 0x348   :  { %v471_v2 = vadd.f32 %v470_v0, %v383_v63 }
 0x349   :  { %v661_v3 = vpop.f32.mrf.mxu0 }
 0x34a   :  { %v476_v6 = vmax.f32 %v471_v2, 0.0 }
 0x34c   :  { %663 = vmatpush3.msra.mxu1 %v476_v6 }
 0x34d   :  { %664 = vmatprep.subr.mxu1 %v724_v4 }
 0x34e   :  { %665 = vmatpush3.msra.mxu1 %v475_v7 }
 0x34f   :  { %666 = vmatprep.subr.mxu1 %v724_v4 }
 0x350   :  { %667 = vmatpush3.msra.mxu1 %v474_v8 }
 0x351   :  { %669 = vmatmul.mubr.msk.f32.vlgmr.msra.gmra.mxu1 %vm291_vm4, %v477_v9 }
 0x352   :  { %691 = shalt.err (!%p688_p4)
}
 0x353   :  { %571 = dma.vmem_to_hbm [thread:$0]  %s569_s30, 128, %s901_s11, [#allocation5]   ;;  %v484_v10 = vlaneseq  ;;  %v482_v12 = vpop.permute.xlu0 %481 }
 0x354   :  { %s728_s9 = smov [#allocation6]  }
 0x355   :  { %v485_v11 = vshrl.u32 %v484_v10, 7  ;;  %s578_s15 = sshll.u32 %s728_s9, 4  ;;  %s579_s15 = int_to_ptr.vmem [resolvable:$true] %s578_s15 }
 0x356   :  { %s700_s16 = scalar_lea.vmem %s579_s15, 16  ;;  %s704_s17 = scalar_lea.vmem %s579_s15, 32 }
 0x357   :  { %v486_v4 = vsub.s32 0, %v485_v11  ;;  %p701_p5 = scmp.ne.s32.totalorder %s579_s15, %s700_s16  ;;  %p705_p6 = scmp.lt.s32.totalorder %s579_s15, %s579_s15 }
 0x358   :  { %p706_p7 = scmp.lt.s32.totalorder %s704_s17, %s700_s16 }
 0x359   :  { %v487_v13 = vrot.slane %v482_v12, %v486_v4 }
 0x35a   :  { %p707_p8 = por %p706_p7, %p705_p6 }
 0x35c   :  { %p708_p9 = pnand %p707_p8, %p701_p5 }
 0x411   :  { %v557_v14 = vpop.f32.mrf.mxu1 }
 0x412   :  { %v558_v15 = vadd.f32 %v557_v14, %v487_v13 }
 0x413   :  { %v670_v16 = vpop.f32.mrf.mxu1 }
 0x414   :  { %561 = vst [vmem:[#allocation6] sm:$0x1] %v558_v15 }
 0x415   :  { %711 = shalt.err (!%p708_p9)
}
 0x416   :  { %581 = dma.vmem_to_hbm [thread:$0]  %s579_s15, 16, %s902_s12, [#allocation7]  }
 0x417   :  { %720 = dma.done.wait [#allocation5], 128  }
 0x418   :  { %721 = vsyncadd [#allocation5], 4294967168 }
 0x419   :  { %722 = dma.done.wait [#allocation7], 16  }
 0x41a   :  { %723 = vsyncadd [#allocation7], 4294967280 }
 0x41b   :  { %588 = vsyncpa [#allocation5], 1 }
 0x41c   :  { %589 = vsyncpa [#allocation7], 1 }

</bundles_post_ra>
